<compile_context>
chip_gen: v5e
topology: v5e:2x2
jax: 0.10.0
libtpu: 0.0.40
codegen_flags: <defaults>
</compile_context>

<pallas_src>
import math
import numpy as np
import jax
import jax.numpy as jnp
from jax.experimental import pallas as pl
from jax.experimental.pallas import tpu as pltpu


def _round_up(x: int, m: int) -> int:
    return ((x + m - 1) // m) * m


def _fft2_kron_mat(h: int, w: int):
    """Concatenated [Re | -Im-of-exp] (L, 2L) Kronecker forward-DFT matrix."""
    nh = np.arange(h)
    nw = np.arange(w)
    # Exact modular reduction keeps angles small and the special entries exact.
    ang_h = 2.0 * np.pi * (np.outer(nh, nh) % h) / h          # (n1, k1)
    ang_w = 2.0 * np.pi * (np.outer(nw, nw) % w) / w          # (n2, k2)
    ang = ang_h[:, None, :, None] + ang_w[None, :, None, :]   # (n1, n2, k1, k2)
    ang = ang.reshape(h * w, h * w)                           # row n1*W+n2, col k1*W+k2
    mr = np.cos(ang)
    mi = -np.sin(ang)

    def snap(m):  # make analytically-exact 0/+-1 entries exact
        m = np.where(np.abs(m) < 1e-12, 0.0, m)
        m = np.where(np.abs(m - 1.0) < 1e-12, 1.0, m)
        m = np.where(np.abs(m + 1.0) < 1e-12, -1.0, m)
        return m

    m = np.concatenate([snap(mr), snap(mi)], axis=1)          # (L, 2L)
    return jnp.asarray(m.astype(np.float32))


def _atan2(y, x):
    """atan2 from VPU/EUP primitives: 1 approx-reciprocal + odd minimax poly."""
    ax = jnp.abs(x)
    ay = jnp.abs(y)
    mx = jnp.maximum(ax, ay)
    mn = jnp.minimum(ax, ay)
    mx_safe = jnp.where(mx == 0.0, 1.0, mx)
    inv = pl.reciprocal(mx_safe, approx=True)       # EUP (cheap slot)
    inv = inv * (2.0 - mx_safe * inv)               # one Newton step on VALU
    t = mn * inv                                    # tan(angle) in [0, 1]
    # Hastings minimax odd polynomial for atan on [-1, 1] (A&S 4.4.47),
    # |err| <= ~1e-5 -- well inside the phase tolerance budget.
    t2 = t * t
    p = 0.0208351
    p = p * t2 - 0.0851330
    p = p * t2 + 0.1801410
    p = p * t2 - 0.3302995
    p = p * t2 + 0.9998660
    a = t * p                                       # atan(t) in [0, pi/4..pi/2]
    a = jnp.where(ay > ax, 0.5 * math.pi - a, a)    # restore octant
    a = jnp.where(x < 0.0, math.pi - a, a)          # quadrants II / III
    return jnp.where(y < 0.0, -a, a)                # lower half plane


def _fft2_amp_phase_kernel(x_ref, m_ref, amp_ref, ph_ref):
    l = amp_ref.shape[-1]
    x = x_ref[...]                                                    # (TB, L) f32
    y = jnp.dot(x, m_ref[...], preferred_element_type=jnp.float32)   # (TB, 2L)
    re = y[:, :l]
    im = y[:, l:]
    amp_ref[...] = jnp.sqrt(re * re + im * im)                        # 1 EUP sqrt
    ph_ref[...] = _atan2(im, re)


def fft_interaction(x: jax.Array, *, tb: int = 512):
    """Pallas TPU FFTInteraction.forward: returns (|fft2(x)|, angle(fft2(x))), NCHW."""
    n, c, h, w = x.shape
    l = h * w
    bc = n * c

    xf = x.reshape(bc, l).astype(jnp.float32)

    # --- batch-tile selection ------------------------------------------------
    # * cap tb at the request and at the (padded) batch size
    # * force >=2 grid blocks when two legal (>=8-row) tiles exist so both v7x
    #   TensorCores get work on the "parallel" grid axis
    # * pick tb ~= ceil(bc / nb) (rounded to 8 sublanes) to minimize tail
    #   padding, since padded rows run the full matmul + epilogue
    tb_cap = max(8, min(_round_up(tb, 8), _round_up(bc, 8)))
    nb = -(-bc // tb_cap)
    if nb == 1 and bc > 8:
        nb = 2
    tb = _round_up(-(-bc // nb), 8)
    bc_pad = nb * tb
    if bc_pad != bc:
        xf = jnp.pad(xf, ((0, bc_pad - bc), (0, 0)))

    m = _fft2_kron_mat(h, w)                       # (L, 2L) = [Re | Im]

    row_spec = pl.BlockSpec((tb, l), lambda i: (i, 0))
    # Constant DFT matrix: same block every step (never re-DMA'd per new data).
    mat_spec = pl.BlockSpec((l, 2 * l), lambda i: (0, 0))

    amp, ph = pl.pallas_call(
        _fft2_amp_phase_kernel,
        out_shape=(jax.ShapeDtypeStruct((bc_pad, l), jnp.float32),
                   jax.ShapeDtypeStruct((bc_pad, l), jnp.float32)),
        grid=(nb,),
        in_specs=[row_spec, mat_spec],
        out_specs=(row_spec, row_spec),
        compiler_params=pltpu.CompilerParams(
            dimension_semantics=("parallel",)),
    )(xf, m)

    amp = amp[:bc].reshape(n, c, h, w)
    ph = ph[:bc].reshape(n, c, h, w)
    return amp, ph


if __name__ == "__main__":
    key = jax.random.PRNGKey(0)
    N, C, H, W = 2, 4, 16, 16
    x = jax.random.uniform(key, (N, C, H, W), dtype=jnp.float32)

    amp, ph = fft_interaction(x)
    amp = jax.block_until_ready(amp)
    ph = jax.block_until_ready(ph)

    # Reference in float64 numpy (matches torch.fft.fft2 / abs / angle semantics).
    x_np = np.asarray(x, dtype=np.float64)
    fft_ref = np.fft.fft2(x_np, axes=(-2, -1))
    amp_ref = np.abs(fft_ref)
    ph_ref = np.angle(fft_ref)

    amp_np = np.asarray(amp, dtype=np.float64)
    ph_np = np.asarray(ph, dtype=np.float64)

    assert np.allclose(amp_np, amp_ref, rtol=2e-4, atol=5e-3), \
        f"amplitude max err {np.max(np.abs(amp_np - amp_ref))}"

    # Phase is only comparable modulo 2*pi and is ill-conditioned where amp ~ 0.
    dphi = np.abs(np.angle(np.exp(1j * (ph_np - ph_ref))))
    mask = amp_ref > 0.5
    assert np.max(dphi[mask]) < 1e-2, f"phase max err {np.max(dphi[mask])}"

    # End-to-end: amplitude * exp(i*phase) must reconstruct fft2(x).
    recon = amp_np * np.exp(1j * ph_np)
    assert np.allclose(recon, fft_ref, rtol=2e-4, atol=5e-3), \
        f"recon max err {np.max(np.abs(recon - fft_ref))}"

    print("KERNEL_OK")
</pallas_src>

<mosaic_0001>
module attributes {stable_mosaic.version = 11 : i64} {
  func.func @_fft2_amp_phase_kernel(%arg0: i32, %arg1: memref<8x256xf32, #tpu.memory_space<vmem>>, %arg2: memref<256x512xf32, #tpu.memory_space<vmem>>, %arg3: memref<8x256xf32, #tpu.memory_space<vmem>>, %arg4: memref<8x256xf32, #tpu.memory_space<vmem>>) attributes {dimension_semantics = [#tpu.dimension_semantics<parallel>], iteration_bounds = array<i64: 1>, scalar_prefetch = 0 : i64, scratch_operands = 0 : i64, tpu.core_type = #tpu.core_type<tc>, window_params = [{transform_indices = @transform_0, window_bounds = array<i64: 8, 256>}, {pipeline_mode = #tpu.pipeline_mode<synchronous>, transform_indices = @transform_1, window_bounds = array<i64: 256, 512>}, {transform_indices = @transform_2, window_bounds = array<i64: 8, 256>}, {transform_indices = @transform_3, window_bounds = array<i64: 8, 256>}]} {
    %c0 = arith.constant 0 : index
    %c0_0 = arith.constant 0 : index
    %0 = vector.load %arg1[%c0, %c0_0] : memref<8x256xf32, #tpu.memory_space<vmem>>, vector<8x256xf32>
    %c0_1 = arith.constant 0 : index
    %c0_2 = arith.constant 0 : index
    %1 = vector.load %arg2[%c0_1, %c0_2] : memref<256x512xf32, #tpu.memory_space<vmem>>, vector<256x512xf32>
    %cst = arith.constant dense<0.000000e+00> : vector<8x512xf32>
    %2 = tpu.matmul %0, %1, %cst {dimension_numbers = #tpu.dot_dimension_numbers<[1], [0], [0], [1], [0, 0, 1, 1], [], []>} : vector<8x256xf32>, vector<256x512xf32>, vector<8x512xf32> -> vector<8x512xf32>
    %3 = vector.extract_strided_slice %2 {offsets = [0, 0], sizes = [8, 256], strides = [1, 1]} : vector<8x512xf32> to vector<8x256xf32>
    %4 = vector.extract_strided_slice %2 {offsets = [0, 256], sizes = [8, 256], strides = [1, 1]} : vector<8x512xf32> to vector<8x256xf32>
    %5 = arith.mulf %3, %3 : vector<8x256xf32>
    %6 = arith.mulf %4, %4 : vector<8x256xf32>
    %7 = arith.addf %5, %6 : vector<8x256xf32>
    %8 = math.sqrt %7 : vector<8x256xf32>
    %c0_3 = arith.constant 0 : index
    %c0_4 = arith.constant 0 : index
    %9 = vector.load %arg3[%c0_3, %c0_4] : memref<8x256xf32, #tpu.memory_space<vmem>>, vector<8x256xf32>
    tpu.vector_store %arg3[%c0_3, %c0_4], %8 {strides = array<i32>} : memref<8x256xf32, #tpu.memory_space<vmem>>, vector<8x256xf32>,
    %10 = math.absf %3 : vector<8x256xf32>
    %11 = math.absf %4 : vector<8x256xf32>
    %12 = arith.maximumf %10, %11 : vector<8x256xf32>
    %13 = arith.minimumf %10, %11 : vector<8x256xf32>
    %cst_5 = arith.constant 0.000000e+00 : f32
    %14 = vector.broadcast %cst_5 : f32 to vector<8x256xf32>
    %15 = arith.cmpf oeq, %12, %14 : vector<8x256xf32>
    %cst_6 = arith.constant 1.000000e+00 : f32
    %16 = vector.broadcast %cst_6 : f32 to vector<8x256xf32>
    %17 = arith.select %15, %16, %12 : vector<8x256xi1>, vector<8x256xf32>
    %18 = tpu.reciprocal %17 {approx = true} : vector<8x256xf32> -> vector<8x256xf32>
    %19 = arith.mulf %17, %18 : vector<8x256xf32>
    %cst_7 = arith.constant 2.000000e+00 : f32
    %20 = vector.broadcast %cst_7 : f32 to vector<8x256xf32>
    %21 = arith.subf %20, %19 : vector<8x256xf32>
    %22 = arith.mulf %18, %21 : vector<8x256xf32>
    %23 = arith.mulf %13, %22 : vector<8x256xf32>
    %24 = arith.mulf %23, %23 : vector<8x256xf32>
    %cst_8 = arith.constant 2.083510e-02 : f32
    %25 = vector.broadcast %cst_8 : f32 to vector<8x256xf32>
    %26 = arith.mulf %25, %24 : vector<8x256xf32>
    %cst_9 = arith.constant 8.513300e-02 : f32
    %27 = vector.broadcast %cst_9 : f32 to vector<8x256xf32>
    %28 = arith.subf %26, %27 : vector<8x256xf32>
    %29 = arith.mulf %28, %24 : vector<8x256xf32>
    %cst_10 = arith.constant 1.801410e-01 : f32
    %30 = vector.broadcast %cst_10 : f32 to vector<8x256xf32>
    %31 = arith.addf %29, %30 : vector<8x256xf32>
    %32 = arith.mulf %31, %24 : vector<8x256xf32>
    %cst_11 = arith.constant 0.330299497 : f32
    %33 = vector.broadcast %cst_11 : f32 to vector<8x256xf32>
    %34 = arith.subf %32, %33 : vector<8x256xf32>
    %35 = arith.mulf %34, %24 : vector<8x256xf32>
    %cst_12 = arith.constant 9.998660e-01 : f32
    %36 = vector.broadcast %cst_12 : f32 to vector<8x256xf32>
    %37 = arith.addf %35, %36 : vector<8x256xf32>
    %38 = arith.mulf %23, %37 : vector<8x256xf32>
    %39 = arith.cmpf ogt, %11, %10 : vector<8x256xf32>
    %cst_13 = arith.constant 1.57079637 : f32
    %40 = vector.broadcast %cst_13 : f32 to vector<8x256xf32>
    %41 = arith.subf %40, %38 : vector<8x256xf32>
    %42 = arith.select %39, %41, %38 : vector<8x256xi1>, vector<8x256xf32>
    %cst_14 = arith.constant 0.000000e+00 : f32
    %43 = vector.broadcast %cst_14 : f32 to vector<8x256xf32>
    %44 = arith.cmpf olt, %3, %43 : vector<8x256xf32>
    %cst_15 = arith.constant 3.14159274 : f32
    %45 = vector.broadcast %cst_15 : f32 to vector<8x256xf32>
    %46 = arith.subf %45, %42 : vector<8x256xf32>
    %47 = arith.select %44, %46, %42 : vector<8x256xi1>, vector<8x256xf32>
    %cst_16 = arith.constant 0.000000e+00 : f32
    %48 = vector.broadcast %cst_16 : f32 to vector<8x256xf32>
    %49 = arith.cmpf olt, %4, %48 : vector<8x256xf32>
    %cst_17 = arith.constant 0.000000e+00 : f32
    %50 = vector.broadcast %cst_17 : f32 to vector<8x256xf32>
    %51 = arith.subf %50, %47 : vector<8x256xf32>
    %52 = arith.select %49, %51, %47 : vector<8x256xi1>, vector<8x256xf32>
    %c0_18 = arith.constant 0 : index
    %c0_19 = arith.constant 0 : index
    %53 = vector.load %arg4[%c0_18, %c0_19] : memref<8x256xf32, #tpu.memory_space<vmem>>, vector<8x256xf32>
    tpu.vector_store %arg4[%c0_18, %c0_19], %52 {strides = array<i32>} : memref<8x256xf32, #tpu.memory_space<vmem>>, vector<8x256xf32>,
    return
  }
  func.func @transform_0(%arg0: i32) -> (i32, i32) {
    %c0_i32 = arith.constant 0 : i32
    %c0_i32_0 = arith.constant 0 : i32
    return %arg0, %c0_i32 : i32, i32
  }
  func.func @transform_1(%arg0: i32) -> (i32, i32) {
    %c0_i32 = arith.constant 0 : i32
    %c0_i32_0 = arith.constant 0 : i32
    %c0_i32_1 = arith.constant 0 : i32
    return %c0_i32, %c0_i32_0 : i32, i32
  }
  func.func @transform_2(%arg0: i32) -> (i32, i32) {
    %c0_i32 = arith.constant 0 : i32
    %c0_i32_0 = arith.constant 0 : i32
    return %arg0, %c0_i32 : i32, i32
  }
  func.func @transform_3(%arg0: i32) -> (i32, i32) {
    %c0_i32 = arith.constant 0 : i32
    %c0_i32_0 = arith.constant 0 : i32
    return %arg0, %c0_i32 : i32, i32
  }
}

</mosaic_0001>

<bundles_post_ra>
// kernel: tpu_custom_call.1
= control target key start
LH: loop header
LB: loop body
LE: loop exit
PB: predicated region body
PF: predicated region fallthrough
CT: control target
= control target key end

     0   :  { %9 = vsyncpa [#allocation3], 0  ;;  %s667_s0 = inlined_call_operand.hbm [shape: f32[8,256], index: 0, kind: input, shape index: {}]   ;;  %s668_s1 = inlined_call_operand.hbm [shape: f32[256,512], index: 1, kind: input, shape index: {}]   ;;  %s669_s2 = inlined_call_operand.hbm [shape: f32[8,256], index: 2, kind: output, shape index: {0}]   ;;  %s670_s3 = inlined_call_operand.hbm [shape: f32[8,256], index: 3, kind: output, shape index: {1}]  }
   0x1   :  { %10 = vsyncpa [#allocation6], 0 }
   0x2   :  { %11 = vsyncpa [#allocation4], 0 }
   0x3   :  { %12 = vsyncpa [#allocation9], 0  ;;  %s18_s14 = sshll.u32 %s667_s0, 4  ;;  %s585_s15 = smov [#allocation2]   ;;  %s19_s14 = int_to_ptr.hbm [resolvable:$true] %s18_s14 }
   0x4   :  { %s20_s16 = sshll.u32 %s585_s15, 4  ;;  %s28_s19 = sshll.u32 %s668_s1, 4  ;;  %s21_s16 = int_to_ptr.vmem [resolvable:$true] %s20_s16  ;;  %s29_s19 = int_to_ptr.hbm [resolvable:$true] %s28_s19 }
   0x5   :  { %23 = dma.hbm_to_vmem [thread:$0]  %s19_s14, 256, %s21_s16, [#allocation3]  }
   0x6   :  { %s586_s20 = smov [#allocation5]   ;;  %s587_s22 = smov 512  }
   0x7   :  { %s30_s21 = sshll.u32 %s586_s20, 4  ;;  %s588_s23 = smov 32   ;;  %s31_s21 = int_to_ptr.vmem [resolvable:$true] %s30_s21 }
   0x8   :  { %36 = dma.hbm_to_vmem [thread:$0]  %s29_s19, 16384, %s31_s21, [#allocation6], %s587_s22, %s587_s22, %s588_s23  }
   0x9   :  { %577 = dma.done.wait [#allocation3], 256  }
   0xa   :  { %578 = vsyncadd [#allocation3], 4294967040 }
   0xb   :  { %579 = dma.done.wait [#allocation6], 16384  }
   0xc   :  { %580 = vsyncadd [#allocation6], 4294950912  ;;  %v107_v0 = vld [vmem:[#allocation5 + $0x1e0] sm:$0xff]  ;;  %v108_v2 = vld [vmem:[#allocation5 + $0x1e8] sm:$0xff]  ;;  %s589_s0 = smov [#allocation7]   ;;  %s436_s26 = sshll.u32 %s669_s2, 4  ;;  %s437_s26 = int_to_ptr.hbm [resolvable:$true] %s436_s26 }
   0xd   :  { %v171_v1 = vld [vmem:[#allocation5 + $0x3e0] sm:$0xff]  ;;  %175 = vmatpush.msra.mxu0 %v107_v0  ;;  %v172_v3 = vld [vmem:[#allocation5 + $0x3e8] sm:$0xff]  ;;  %215 = vmatpush.msra.mxu2 %v108_v2  ;;  %v109_v0 = vld [vmem:[#allocation5 + $0x1f0] sm:$0xff]  ;;  %s434_s1 = sshll.u32 %s589_s0, 4  ;;  %s590_s2 = smov [#allocation8]   ;;  %s435_s1 = int_to_ptr.vmem [resolvable:$true] %s434_s1 }
   0xe   :  { %195 = vmatpush.msra.mxu1 %v171_v1  ;;  %v103_v4 = vld [vmem:[#allocation5 + $0x1c0] sm:$0xff]  ;;  %235 = vmatpush.msra.mxu3 %v172_v3  ;;  %v104_v6 = vld [vmem:[#allocation5 + $0x1c8] sm:$0xff]  ;;  %v173_v1 = vld [vmem:[#allocation5 + $0x3f0] sm:$0xff]  ;;  %s445_s27 = sshll.u32 %s590_s2, 4  ;;  %s447_s30 = sshll.u32 %s670_s3, 4  ;;  %s446_s27 = int_to_ptr.vmem [resolvable:$true] %s445_s27  ;;  %s448_s30 = int_to_ptr.hbm [resolvable:$true] %s447_s30 }
   0xf   :  { %v167_v5 = vld [vmem:[#allocation5 + $0x3c0] sm:$0xff]  ;;  %v168_v7 = vld [vmem:[#allocation5 + $0x3c8] sm:$0xff]  ;;  %176 = vmatpush.msra.mxu0 %v103_v4  ;;  %216 = vmatpush.msra.mxu2 %v104_v6  ;;  %v110_v2 = vld [vmem:[#allocation5 + $0x1f8] sm:$0xff] }
  0x10   :  { %v99_v8 = vld [vmem:[#allocation5 + $0x1a0] sm:$0xff]  ;;  %196 = vmatpush.msra.mxu1 %v167_v5  ;;  %v100_v10 = vld [vmem:[#allocation5 + $0x1a8] sm:$0xff]  ;;  %236 = vmatpush.msra.mxu3 %v168_v7  ;;  %v174_v3 = vld [vmem:[#allocation5 + $0x3f8] sm:$0xff] }
  0x11   :  { %v163_v9 = vld [vmem:[#allocation5 + $0x3a0] sm:$0xff]  ;;  %v164_v11 = vld [vmem:[#allocation5 + $0x3a8] sm:$0xff]  ;;  %177 = vmatpush.msra.mxu0 %v99_v8  ;;  %217 = vmatpush.msra.mxu2 %v100_v10  ;;  %v105_v4 = vld [vmem:[#allocation5 + $0x1d0] sm:$0xff] }
  0x12   :  { %v95_v12 = vld [vmem:[#allocation5 + $0x180] sm:$0xff]  ;;  %197 = vmatpush.msra.mxu1 %v163_v9  ;;  %v96_v14 = vld [vmem:[#allocation5 + $0x188] sm:$0xff]  ;;  %237 = vmatpush.msra.mxu3 %v164_v11  ;;  %v169_v5 = vld [vmem:[#allocation5 + $0x3d0] sm:$0xff] }
  0x13   :  { %v159_v13 = vld [vmem:[#allocation5 + $0x380] sm:$0xff]  ;;  %v160_v15 = vld [vmem:[#allocation5 + $0x388] sm:$0xff]  ;;  %178 = vmatpush.msra.mxu0 %v95_v12  ;;  %218 = vmatpush.msra.mxu2 %v96_v14  ;;  %v106_v6 = vld [vmem:[#allocation5 + $0x1d8] sm:$0xff] }
  0x14   :  { %v91_v16 = vld [vmem:[#allocation5 + $0x160] sm:$0xff]  ;;  %198 = vmatpush.msra.mxu1 %v159_v13  ;;  %v92_v18 = vld [vmem:[#allocation5 + $0x168] sm:$0xff]  ;;  %238 = vmatpush.msra.mxu3 %v160_v15  ;;  %v170_v7 = vld [vmem:[#allocation5 + $0x3d8] sm:$0xff] }
  0x15   :  { %v155_v17 = vld [vmem:[#allocation5 + $0x360] sm:$0xff]  ;;  %v156_v19 = vld [vmem:[#allocation5 + $0x368] sm:$0xff]  ;;  %179 = vmatpush.msra.mxu0 %v91_v16  ;;  %219 = vmatpush.msra.mxu2 %v92_v18  ;;  %v101_v8 = vld [vmem:[#allocation5 + $0x1b0] sm:$0xff] }
  0x16   :  { %v87_v20 = vld [vmem:[#allocation5 + $0x140] sm:$0xff]  ;;  %199 = vmatpush.msra.mxu1 %v155_v17  ;;  %v88_v22 = vld [vmem:[#allocation5 + $0x148] sm:$0xff]  ;;  %239 = vmatpush.msra.mxu3 %v156_v19  ;;  %v165_v9 = vld [vmem:[#allocation5 + $0x3b0] sm:$0xff] }
  0x17   :  { %v151_v21 = vld [vmem:[#allocation5 + $0x340] sm:$0xff]  ;;  %v152_v23 = vld [vmem:[#allocation5 + $0x348] sm:$0xff]  ;;  %180 = vmatpush.msra.mxu0 %v87_v20  ;;  %220 = vmatpush.msra.mxu2 %v88_v22  ;;  %v102_v10 = vld [vmem:[#allocation5 + $0x1b8] sm:$0xff] }
  0x18   :  { %v83_v24 = vld [vmem:[#allocation5 + $0x120] sm:$0xff]  ;;  %200 = vmatpush.msra.mxu1 %v151_v21  ;;  %v84_v26 = vld [vmem:[#allocation5 + $0x128] sm:$0xff]  ;;  %240 = vmatpush.msra.mxu3 %v152_v23  ;;  %v166_v11 = vld [vmem:[#allocation5 + $0x3b8] sm:$0xff] }
  0x19   :  { %v147_v25 = vld [vmem:[#allocation5 + $0x320] sm:$0xff]  ;;  %v148_v27 = vld [vmem:[#allocation5 + $0x328] sm:$0xff]  ;;  %181 = vmatpush.msra.mxu0 %v83_v24  ;;  %221 = vmatpush.msra.mxu2 %v84_v26  ;;  %v97_v12 = vld [vmem:[#allocation5 + $0x190] sm:$0xff] }
  0x1a   :  { %v79_v28 = vld [vmem:[#allocation5 + $0x100] sm:$0xff]  ;;  %201 = vmatpush.msra.mxu1 %v147_v25  ;;  %v80_v30 = vld [vmem:[#allocation5 + $0x108] sm:$0xff]  ;;  %241 = vmatpush.msra.mxu3 %v148_v27  ;;  %v161_v13 = vld [vmem:[#allocation5 + $0x390] sm:$0xff] }
  0x1b   :  { %v143_v29 = vld [vmem:[#allocation5 + $0x300] sm:$0xff]  ;;  %v144_v31 = vld [vmem:[#allocation5 + $0x308] sm:$0xff]  ;;  %182 = vmatpush.msra.mxu0 %v79_v28  ;;  %222 = vmatpush.msra.mxu2 %v80_v30  ;;  %v98_v14 = vld [vmem:[#allocation5 + $0x198] sm:$0xff] }
  0x1c   :  { %v75_v32 = vld [vmem:[#allocation5 + $0xe0] sm:$0xff]  ;;  %202 = vmatpush.msra.mxu1 %v143_v29  ;;  %v76_v34 = vld [vmem:[#allocation5 + $0xe8] sm:$0xff]  ;;  %242 = vmatpush.msra.mxu3 %v144_v31  ;;  %v162_v15 = vld [vmem:[#allocation5 + $0x398] sm:$0xff] }
  0x1d   :  { %v139_v33 = vld [vmem:[#allocation5 + $0x2e0] sm:$0xff]  ;;  %v140_v35 = vld [vmem:[#allocation5 + $0x2e8] sm:$0xff]  ;;  %183 = vmatpush.msra.mxu0 %v75_v32  ;;  %223 = vmatpush.msra.mxu2 %v76_v34  ;;  %v93_v16 = vld [vmem:[#allocation5 + $0x170] sm:$0xff] }
  0x1e   :  { %v71_v36 = vld [vmem:[#allocation5 + $0xc0] sm:$0xff]  ;;  %203 = vmatpush.msra.mxu1 %v139_v33  ;;  %v72_v38 = vld [vmem:[#allocation5 + $0xc8] sm:$0xff]  ;;  %243 = vmatpush.msra.mxu3 %v140_v35  ;;  %v157_v17 = vld [vmem:[#allocation5 + $0x370] sm:$0xff] }
  0x1f   :  { %v135_v37 = vld [vmem:[#allocation5 + $0x2c0] sm:$0xff]  ;;  %v136_v39 = vld [vmem:[#allocation5 + $0x2c8] sm:$0xff]  ;;  %184 = vmatpush.msra.mxu0 %v71_v36  ;;  %224 = vmatpush.msra.mxu2 %v72_v38  ;;  %v94_v18 = vld [vmem:[#allocation5 + $0x178] sm:$0xff] }
  0x20   :  { %v67_v40 = vld [vmem:[#allocation5 + $0xa0] sm:$0xff]  ;;  %204 = vmatpush.msra.mxu1 %v135_v37  ;;  %v68_v42 = vld [vmem:[#allocation5 + $0xa8] sm:$0xff]  ;;  %244 = vmatpush.msra.mxu3 %v136_v39  ;;  %v158_v19 = vld [vmem:[#allocation5 + $0x378] sm:$0xff] }
  0x21   :  { %v131_v41 = vld [vmem:[#allocation5 + $0x2a0] sm:$0xff]  ;;  %v132_v43 = vld [vmem:[#allocation5 + $0x2a8] sm:$0xff]  ;;  %185 = vmatpush.msra.mxu0 %v67_v40  ;;  %225 = vmatpush.msra.mxu2 %v68_v42  ;;  %v89_v20 = vld [vmem:[#allocation5 + $0x150] sm:$0xff] }
  0x22   :  { %v63_v44 = vld [vmem:[#allocation5 + $0x80] sm:$0xff]  ;;  %205 = vmatpush.msra.mxu1 %v131_v41  ;;  %v64_v46 = vld [vmem:[#allocation5 + $0x88] sm:$0xff]  ;;  %245 = vmatpush.msra.mxu3 %v132_v43  ;;  %v153_v21 = vld [vmem:[#allocation5 + $0x350] sm:$0xff] }
  0x23   :  { %v127_v45 = vld [vmem:[#allocation5 + $0x280] sm:$0xff]  ;;  %v128_v47 = vld [vmem:[#allocation5 + $0x288] sm:$0xff]  ;;  %186 = vmatpush.msra.mxu0 %v63_v44  ;;  %226 = vmatpush.msra.mxu2 %v64_v46  ;;  %v90_v22 = vld [vmem:[#allocation5 + $0x158] sm:$0xff] }
  0x24   :  { %v59_v48 = vld [vmem:[#allocation5 + $0x60] sm:$0xff]  ;;  %206 = vmatpush.msra.mxu1 %v127_v45  ;;  %v60_v50 = vld [vmem:[#allocation5 + $0x68] sm:$0xff]  ;;  %246 = vmatpush.msra.mxu3 %v128_v47  ;;  %v154_v23 = vld [vmem:[#allocation5 + $0x358] sm:$0xff] }
  0x25   :  { %v123_v49 = vld [vmem:[#allocation5 + $0x260] sm:$0xff]  ;;  %v124_v51 = vld [vmem:[#allocation5 + $0x268] sm:$0xff]  ;;  %187 = vmatpush.msra.mxu0 %v59_v48  ;;  %227 = vmatpush.msra.mxu2 %v60_v50  ;;  %v85_v24 = vld [vmem:[#allocation5 + $0x130] sm:$0xff] }
  0x26   :  { %v55_v52 = vld [vmem:[#allocation5 + $0x40] sm:$0xff]  ;;  %207 = vmatpush.msra.mxu1 %v123_v49  ;;  %v56_v54 = vld [vmem:[#allocation5 + $0x48] sm:$0xff]  ;;  %247 = vmatpush.msra.mxu3 %v124_v51  ;;  %v149_v25 = vld [vmem:[#allocation5 + $0x330] sm:$0xff] }
  0x27   :  { %v119_v53 = vld [vmem:[#allocation5 + $0x240] sm:$0xff]  ;;  %v120_v55 = vld [vmem:[#allocation5 + $0x248] sm:$0xff]  ;;  %188 = vmatpush.msra.mxu0 %v55_v52  ;;  %228 = vmatpush.msra.mxu2 %v56_v54  ;;  %v86_v26 = vld [vmem:[#allocation5 + $0x138] sm:$0xff] }
  0x28   :  { %v51_v56 = vld [vmem:[#allocation5 + $0x20] sm:$0xff]  ;;  %208 = vmatpush.msra.mxu1 %v119_v53  ;;  %v52_v58 = vld [vmem:[#allocation5 + $0x28] sm:$0xff]  ;;  %248 = vmatpush.msra.mxu3 %v120_v55  ;;  %v150_v27 = vld [vmem:[#allocation5 + $0x338] sm:$0xff] }
  0x29   :  { %v115_v57 = vld [vmem:[#allocation5 + $0x220] sm:$0xff]  ;;  %v116_v59 = vld [vmem:[#allocation5 + $0x228] sm:$0xff]  ;;  %189 = vmatpush.msra.mxu0 %v51_v56  ;;  %229 = vmatpush.msra.mxu2 %v52_v58  ;;  %v81_v28 = vld [vmem:[#allocation5 + $0x110] sm:$0xff] }
  0x2a   :  { %v47_v60 = vld [vmem:[#allocation5] sm:$0xff]  ;;  %209 = vmatpush.msra.mxu1 %v115_v57  ;;  %v48_v62 = vld [vmem:[#allocation5 + $0x8] sm:$0xff]  ;;  %249 = vmatpush.msra.mxu3 %v116_v59  ;;  %v145_v29 = vld [vmem:[#allocation5 + $0x310] sm:$0xff] }
  0x2b   :  { %v111_v61 = vld [vmem:[#allocation5 + $0x200] sm:$0xff]  ;;  %v112_v63 = vld [vmem:[#allocation5 + $0x208] sm:$0xff]  ;;  %190 = vmatpush.msra.mxu0 %v47_v60  ;;  %230 = vmatpush.msra.mxu2 %v48_v62  ;;  %v82_v30 = vld [vmem:[#allocation5 + $0x118] sm:$0xff] }
  0x2c   :  { %210 = vmatpush.msra.mxu1 %v111_v61  ;;  %250 = vmatpush.msra.mxu3 %v112_v63  ;;  %v146_v31 = vld [vmem:[#allocation5 + $0x318] sm:$0xff]  ;;  %v77_v32 = vld [vmem:[#allocation5 + $0xf0] sm:$0xff] }
  0x2d   :  { %255 = vmatpush.msrb.mxu0 %v109_v0  ;;  %295 = vmatpush.msrb.mxu2 %v110_v2  ;;  %v141_v33 = vld [vmem:[#allocation5 + $0x2f0] sm:$0xff]  ;;  %v78_v34 = vld [vmem:[#allocation5 + $0xf8] sm:$0xff] }
  0x2e   :  { %275 = vmatpush.msrb.mxu1 %v173_v1  ;;  %315 = vmatpush.msrb.mxu3 %v174_v3  ;;  %v142_v35 = vld [vmem:[#allocation5 + $0x2f8] sm:$0xff]  ;;  %v73_v36 = vld [vmem:[#allocation5 + $0xd0] sm:$0xff] }
  0x2f   :  { %256 = vmatpush.msrb.mxu0 %v105_v4  ;;  %296 = vmatpush.msrb.mxu2 %v106_v6  ;;  %v137_v37 = vld [vmem:[#allocation5 + $0x2d0] sm:$0xff]  ;;  %v74_v38 = vld [vmem:[#allocation5 + $0xd8] sm:$0xff] }
  0x30   :  { %276 = vmatpush.msrb.mxu1 %v169_v5  ;;  %316 = vmatpush.msrb.mxu3 %v170_v7  ;;  %v138_v39 = vld [vmem:[#allocation5 + $0x2d8] sm:$0xff]  ;;  %v69_v40 = vld [vmem:[#allocation5 + $0xb0] sm:$0xff] }
  0x31   :  { %257 = vmatpush.msrb.mxu0 %v101_v8  ;;  %297 = vmatpush.msrb.mxu2 %v102_v10  ;;  %v133_v41 = vld [vmem:[#allocation5 + $0x2b0] sm:$0xff]  ;;  %v70_v42 = vld [vmem:[#allocation5 + $0xb8] sm:$0xff] }
  0x32   :  { %277 = vmatpush.msrb.mxu1 %v165_v9  ;;  %317 = vmatpush.msrb.mxu3 %v166_v11  ;;  %v134_v43 = vld [vmem:[#allocation5 + $0x2b8] sm:$0xff]  ;;  %v65_v44 = vld [vmem:[#allocation5 + $0x90] sm:$0xff] }
  0x33   :  { %258 = vmatpush.msrb.mxu0 %v97_v12  ;;  %298 = vmatpush.msrb.mxu2 %v98_v14  ;;  %v129_v45 = vld [vmem:[#allocation5 + $0x290] sm:$0xff]  ;;  %v66_v46 = vld [vmem:[#allocation5 + $0x98] sm:$0xff] }
  0x34   :  { %278 = vmatpush.msrb.mxu1 %v161_v13  ;;  %318 = vmatpush.msrb.mxu3 %v162_v15  ;;  %v130_v47 = vld [vmem:[#allocation5 + $0x298] sm:$0xff]  ;;  %v45_v48 = vld [vmem:[#allocation2] sm:$0xff] }
  0x35   :  { %259 = vmatpush.msrb.mxu0 %v93_v16  ;;  %299 = vmatpush.msrb.mxu2 %v94_v18  ;;  %v46_v49 = vld [vmem:[#allocation2 + $0x8] sm:$0xff]  ;;  %v61_v50 = vld [vmem:[#allocation5 + $0x70] sm:$0xff] }
  0x36   :  { %279 = vmatpush.msrb.mxu1 %v157_v17  ;;  %319 = vmatpush.msrb.mxu3 %v158_v19  ;;  %v125_v51 = vld [vmem:[#allocation5 + $0x270] sm:$0xff]  ;;  %v62_v52 = vld [vmem:[#allocation5 + $0x78] sm:$0xff] }
  0x37   :  { %260 = vmatpush.msrb.mxu0 %v89_v20  ;;  %300 = vmatpush.msrb.mxu2 %v90_v22  ;;  %v126_v53 = vld [vmem:[#allocation5 + $0x278] sm:$0xff]  ;;  %v57_v54 = vld [vmem:[#allocation5 + $0x50] sm:$0xff] }
  0x38   :  { %280 = vmatpush.msrb.mxu1 %v153_v21  ;;  %320 = vmatpush.msrb.mxu3 %v154_v23  ;;  %v121_v55 = vld [vmem:[#allocation5 + $0x250] sm:$0xff]  ;;  %v58_v56 = vld [vmem:[#allocation5 + $0x58] sm:$0xff] }
  0x39   :  { %261 = vmatpush.msrb.mxu0 %v85_v24  ;;  %301 = vmatpush.msrb.mxu2 %v86_v26  ;;  %v122_v57 = vld [vmem:[#allocation5 + $0x258] sm:$0xff]  ;;  %v53_v58 = vld [vmem:[#allocation5 + $0x30] sm:$0xff] }
  0x3a   :  { %281 = vmatpush.msrb.mxu1 %v149_v25  ;;  %321 = vmatpush.msrb.mxu3 %v150_v27  ;;  %v117_v59 = vld [vmem:[#allocation5 + $0x230] sm:$0xff]  ;;  %v54_v60 = vld [vmem:[#allocation5 + $0x38] sm:$0xff] }
  0x3b   :  { %262 = vmatpush.msrb.mxu0 %v81_v28  ;;  %302 = vmatpush.msrb.mxu2 %v82_v30  ;;  %v118_v61 = vld [vmem:[#allocation5 + $0x238] sm:$0xff]  ;;  %v49_v62 = vld [vmem:[#allocation5 + $0x10] sm:$0xff] }
  0x3c   :  { %282 = vmatpush.msrb.mxu1 %v145_v29  ;;  %322 = vmatpush.msrb.mxu3 %v146_v31  ;;  %v113_v63 = vld [vmem:[#allocation5 + $0x210] sm:$0xff]  ;;  %v50_v0 = vld [vmem:[#allocation5 + $0x18] sm:$0xff] }
  0x3d   :  { %263 = vmatpush.msrb.mxu0 %v77_v32  ;;  %303 = vmatpush.msrb.mxu2 %v78_v34  ;;  %v114_v1 = vld [vmem:[#allocation5 + $0x218] sm:$0xff] }
  0x3e   :  { %283 = vmatpush.msrb.mxu1 %v141_v33  ;;  %323 = vmatpush.msrb.mxu3 %v142_v35 }
  0x3f   :  { %264 = vmatpush.msrb.mxu0 %v73_v36  ;;  %304 = vmatpush.msrb.mxu2 %v74_v38 }
  0x40   :  { %284 = vmatpush.msrb.mxu1 %v137_v37  ;;  %324 = vmatpush.msrb.mxu3 %v138_v39 }
  0x41   :  { %265 = vmatpush.msrb.mxu0 %v69_v40  ;;  %305 = vmatpush.msrb.mxu2 %v70_v42 }
  0x42   :  { %285 = vmatpush.msrb.mxu1 %v133_v41  ;;  %325 = vmatpush.msrb.mxu3 %v134_v43 }
  0x43   :  { %266 = vmatpush.msrb.mxu0 %v65_v44  ;;  %306 = vmatpush.msrb.mxu2 %v66_v46 }
  0x44   :  { %286 = vmatpush.msrb.mxu1 %v129_v45  ;;  %326 = vmatpush.msrb.mxu3 %v130_v47 }
  0x45   :  { %191 = vmatmul.f32.vlgmr.msra.gmra.mxu0 %v45_v48  ;;  %211 = vmatmul.f32.vlgmr.msra.gmra.mxu1 %v46_v49 }
  0x46   :  { %231 = vmatmul.f32.vlgmr.msra.gmra.mxu2 %v45_v48  ;;  %251 = vmatmul.f32.vlgmr.msra.gmra.mxu3 %v46_v49 }
  0x47   :  { %267 = vmatpush.msrb.mxu0 %v61_v50  ;;  %287 = vmatpush.msrb.mxu1 %v125_v51 }
  0x48   :  { %307 = vmatpush.msrb.mxu2 %v62_v52  ;;  %327 = vmatpush.msrb.mxu3 %v126_v53 }
  0x49   :  { %268 = vmatpush.msrb.mxu0 %v57_v54  ;;  %288 = vmatpush.msrb.mxu1 %v121_v55 }
  0x4a   :  { %308 = vmatpush.msrb.mxu2 %v58_v56  ;;  %328 = vmatpush.msrb.mxu3 %v122_v57 }
  0x4b   :  { %269 = vmatpush.msrb.mxu0 %v53_v58  ;;  %289 = vmatpush.msrb.mxu1 %v117_v59 }
  0x4c   :  { %309 = vmatpush.msrb.mxu2 %v54_v60  ;;  %329 = vmatpush.msrb.mxu3 %v118_v61 }
  0x4d   :  { %270 = vmatpush.msrb.mxu0 %v49_v62  ;;  %290 = vmatpush.msrb.mxu1 %v113_v63 }
  0x4e   :  { %310 = vmatpush.msrb.mxu2 %v50_v0  ;;  %330 = vmatpush.msrb.mxu3 %v114_v1 }
  0x4f   :  { %271 = vmatmul.f32.vlgmr.msrb.gmra.mxu0 %v45_v48  ;;  %291 = vmatmul.f32.vlgmr.msrb.gmra.mxu1 %v46_v49 }
  0x50   :  { %311 = vmatmul.f32.vlgmr.msrb.gmra.mxu2 %v45_v48  ;;  %331 = vmatmul.f32.vlgmr.msrb.gmra.mxu3 %v46_v49 }
  0xc2   :  { %v192_v2 = vpop.f32.mrf.mxu0  ;;  %v212_v3 = vpop.f32.mrf.mxu1 }
  0xc3   :  { %v617_v6 = vadd.f32 %v212_v3, %v192_v2 }
  0xc5   :  { %v335_v10 = vmul.f32 %v617_v6, %v617_v6  ;;  %v624_v11 = vand.u32 2147483647, %v617_v6  ;;  %vm415_vm7 = vcmp.lt.f32.partialorder %v617_v6, 0.0 }
  0xc9   :  { %v232_v4 = vpop.f32.mrf.mxu2  ;;  %v252_v5 = vpop.f32.mrf.mxu3 }
  0xca   :  { %v633_v16 = vadd.f32 %v252_v5, %v232_v4 }
  0xcc   :  { %v272_v7 = vpop.f32.mrf.mxu0  ;;  %v292_v8 = vpop.f32.mrf.mxu1  ;;  %v336_v21 = vmul.f32 %v633_v16, %v633_v16  ;;  %v640_v22 = vand.u32 2147483647, %v633_v16  ;;  %vm416_vm10 = vcmp.lt.f32.partialorder %v633_v16, 0.0 }
  0xcd   :  { %v619_v9 = vadd.f32 %v292_v8, %v272_v7 }
  0xcf   :  { %v337_v12 = vmul.f32 %v619_v9, %v619_v9  ;;  %v629_v13 = vand.u32 2147483647, %v619_v9  ;;  %vm421_vm8 = vcmp.lt.f32.partialorder %v619_v9, 0.0 }
  0xd1   :  { %v339_v14 = vadd.f32 %v337_v12, %v335_v10  ;;  %v371_v15 = vmax.f32 %v624_v11, %v629_v13  ;;  %v373_v36 = vmin.f32 %v624_v11, %v629_v13  ;;  %vm409_vm6 = vcmp.gt.f32.partialorder %v629_v13, %v624_v11 }
  0xd3   :  { %vm375_vm0 = vcmp.eq.f32.partialorder %v371_v15, 0.0  ;;  %v312_v17 = vpop.f32.mrf.mxu2  ;;  %v332_v18 = vpop.f32.mrf.mxu3  ;;  %473 = vrsqrt.f32 %v339_v14  ;;  %vm348_vm2 = vcmp.eq.f32.partialorder %v339_v14, inf  ;;  %v351_v48 = vand.u32 2147483648, %v339_v14 }
  0xd4   :  { %v377_v19 = vsel %vm375_vm0, 1.0, %v371_v15  ;;  %v635_v20 = vadd.f32 %v332_v18, %v312_v17  ;;  %vm350_vm3 = vcmp.eq.f32.partialorder %v339_v14, 0.0 }
  0xd5   :  { %475 = vrcp.f32 %v377_v19 }
  0xd6   :  { %v338_v23 = vmul.f32 %v635_v20, %v635_v20  ;;  %v645_v24 = vand.u32 2147483647, %v635_v20  ;;  %vm422_vm11 = vcmp.lt.f32.partialorder %v635_v20, 0.0 }
  0xd8   :  { %v340_v25 = vadd.f32 %v338_v23, %v336_v21  ;;  %v372_v26 = vmax.f32 %v640_v22, %v645_v24  ;;  %v374_v52 = vmin.f32 %v640_v22, %v645_v24  ;;  %vm410_vm9 = vcmp.gt.f32.partialorder %v645_v24, %v640_v22 }
  0xd9   :  { %v474_v27 = vpop.eup %473 }
  0xda   :  { %vm376_vm1 = vcmp.eq.f32.partialorder %v372_v26, 0.0  ;;  %v342_v28 = vmul.f32 %v474_v27, %v339_v14  ;;  %477 = vrsqrt.f32 %v340_v25  ;;  %vm360_vm4 = vcmp.eq.f32.partialorder %v340_v25, inf }
  0xdb   :  { %v476_v29 = vpop.eup %475  ;;  %v378_v30 = vsel %vm376_vm1, 1.0, %v372_v26  ;;  %v363_v63 = vand.u32 2147483648, %v340_v25  ;;  %vm362_vm5 = vcmp.eq.f32.partialorder %v340_v25, 0.0 }
  0xdc   :  { %v381_v31 = vmul.f32 %v476_v29, %v377_v19  ;;  %479 = vrcp.f32 %v378_v30  ;;  %v343_v32 = vmul.f32 %v474_v27, %v342_v28 }
  0xde   :  { %v383_v33 = vsub.f32 2.0, %v381_v31  ;;  %v344_v34 = vmul.f32 0.5, %v343_v32 }
  0xe0   :  { %v478_v35 = vpop.eup %477  ;;  %v385_v37 = vmul.f32 %v476_v29, %v383_v33  ;;  %v345_v38 = vsub.f32 1.5, %v344_v34 }
  0xe1   :  { %v354_v39 = vmul.f32 %v478_v35, %v340_v25 }
  0xe2   :  { %v480_v40 = vpop.eup %479  ;;  %v387_v41 = vmul.f32 %v385_v37, %v373_v36  ;;  %v346_v42 = vmul.f32 %v474_v27, %v345_v38 }
  0xe3   :  { %v382_v43 = vmul.f32 %v480_v40, %v378_v30  ;;  %v355_v44 = vmul.f32 %v478_v35, %v354_v39 }
  0xe4   :  { %v389_v45 = vmul.f32 %v387_v41, %v387_v41  ;;  %v347_v46 = vmul.f32 %v346_v42, %v339_v14 }
  0xe5   :  { %v384_v47 = vsub.f32 2.0, %v382_v43  ;;  %v356_v49 = vmul.f32 0.5, %v355_v44 }
  0xe6   :  { %v391_v50 = vmul.f32 0.0208351, %v389_v45  ;;  %v349_v51 = vsel %vm348_vm2, %v339_v14, %v347_v46 }
  0xe7   :  { %v386_v53 = vmul.f32 %v480_v40, %v384_v47  ;;  %v352_v54 = vsel %vm350_vm3, %v351_v48, %v349_v51  ;;  %v357_v55 = vsub.f32 1.5, %v356_v49 }
  0xe8   :  { %v463_v56 = vadd.f32 -0.085133, %v391_v50  ;;  %365 = vst [vmem:[#allocation7] sm:$0xff] %v352_v54 }
  0xe9   :  { %v388_v57 = vmul.f32 %v386_v53, %v374_v52  ;;  %v358_v58 = vmul.f32 %v478_v35, %v357_v55 }
  0xea   :  { %v395_v59 = vmul.f32 %v463_v56, %v389_v45 }
  0xeb   :  { %v390_v60 = vmul.f32 %v388_v57, %v388_v57  ;;  %v359_v61 = vmul.f32 %v358_v58, %v340_v25 }
  0xec   :  { %v397_v62 = vadd.f32 0.180141, %v395_v59 }
  0xed   :  { %v392_v0 = vmul.f32 0.0208351, %v390_v60  ;;  %v361_v1 = vsel %vm360_vm4, %v340_v25, %v359_v61 }
  0xee   :  { %v399_v2 = vmul.f32 %v397_v62, %v389_v45  ;;  %v364_v3 = vsel %vm362_vm5, %v363_v63, %v361_v1 }
  0xef   :  { %v464_v4 = vadd.f32 -0.085133, %v392_v0  ;;  %366 = vst [vmem:[#allocation7 + $0x8] sm:$0xff] %v364_v3 }
  0xf0   :  { %v465_v5 = vadd.f32 -0.3302995, %v399_v2  ;;  %439 = dma.vmem_to_hbm [thread:$0]  %s435_s1, 256, %s437_s26, [#allocation4]  }
  0xf1   :  { %v396_v7 = vmul.f32 %v464_v4, %v390_v60 }
  0xf2   :  { %v403_v8 = vmul.f32 %v465_v5, %v389_v45 }
  0xf3   :  { %v398_v10 = vadd.f32 0.180141, %v396_v7 }
  0xf4   :  { %v405_v12 = vadd.f32 0.999866, %v403_v8 }
  0xf5   :  { %v400_v14 = vmul.f32 %v398_v10, %v390_v60 }
  0xf6   :  { %v407_v15 = vmul.f32 %v405_v12, %v387_v41 }
  0xf7   :  { %v466_v17 = vadd.f32 -0.3302995, %v400_v14 }
  0xf8   :  { %v411_v18 = vsub.f32 1.5707964, %v407_v15 }
  0xf9   :  { %v404_v19 = vmul.f32 %v466_v17, %v390_v60 }
  0xfa   :  { %v413_v21 = vsel %vm409_vm6, %v411_v18, %v407_v15 }
  0xfb   :  { %v406_v23 = vadd.f32 0.999866, %v404_v19  ;;  %v417_v25 = vsub.f32 3.1415927, %v413_v21 }
  0xfd   :  { %v408_v26 = vmul.f32 %v406_v23, %v388_v57  ;;  %v419_v27 = vsel %vm415_vm7, %v417_v25, %v413_v21 }
  0xfe   :  { %v423_v28 = vsub.f32 0.0, %v419_v27 }
  0xff   :  { %v412_v29 = vsub.f32 1.5707964, %v408_v26 }
 0x100   :  { %v425_v30 = vsel %vm421_vm8, %v423_v28, %v419_v27 }
 0x101   :  { %v414_v31 = vsel %vm410_vm9, %v412_v29, %v408_v26  ;;  %427 = vst [vmem:[#allocation8] sm:$0xff] %v425_v30 }
 0x102   :  { %v418_v32 = vsub.f32 3.1415927, %v414_v31 }
 0x104   :  { %v420_v6 = vsel %vm416_vm10, %v418_v32, %v414_v31 }
 0x105   :  { %v424_v11 = vsub.f32 0.0, %v420_v6 }
 0x107   :  { %v426_v9 = vsel %vm422_vm11, %v424_v11, %v420_v6 }
 0x108   :  { %428 = vst [vmem:[#allocation8 + $0x8] sm:$0xff] %v426_v9 }
 0x109   :  { %450 = dma.vmem_to_hbm [thread:$0]  %s446_s27, 256, %s448_s30, [#allocation9]  }
 0x10a   :  { %581 = dma.done.wait [#allocation4], 256  }
 0x10b   :  { %582 = vsyncadd [#allocation4], 4294967040 }
 0x10c   :  { %583 = dma.done.wait [#allocation9], 256  }
 0x10d   :  { %584 = vsyncadd [#allocation9], 4294967040 }
 0x10e   :  { %459 = vsyncpa [#allocation3], 1 }
 0x10f   :  { %460 = vsyncpa [#allocation6], 1 }
 0x110   :  { %461 = vsyncpa [#allocation4], 1 }
 0x111   :  { %462 = vsyncpa [#allocation9], 1 }

</bundles_post_ra>
